<compile_context>
chip_gen: v6e
topology: v6e:2x2x1
jax: 0.10.0
libtpu: 0.0.40
codegen_flags: <defaults>
</compile_context>

<pallas_src>
import jax
import jax.numpy as jnp
from jax.experimental import pallas as pl
from jax.experimental.pallas import tpu as pltpu

LN_EPS = 1e-5       # PyTorch nn.LayerNorm default
OUT_LANES = 128     # lane-dense output padding (column 0 holds q)

# TODO(synk): tiny feature dims (fc1=64, fc2=32, n_actions=4) underfill the
# 128-lane vregs; if the real model keeps them this small, pad the feature
# axes to 128 (with LayerNorm mean/var masked to the true width) or rely on
# XLA fusion instead of a custom kernel.


def _round_up(x, m):
    return ((x + m - 1) // m) * m


def _layernorm(x, gamma, beta):
    mu = jnp.mean(x, axis=-1, keepdims=True)
    var = jnp.mean((x - mu) * (x - mu), axis=-1, keepdims=True)  # biased, like torch
    return (x - mu) * jax.lax.rsqrt(var + LN_EPS) * gamma + beta


def critic_kernel(state_ref, action_ref,
                  w1_ref, b1_ref, g1_ref, be1_ref,
                  w2_ref, b2_ref, g2_ref, be2_ref,
                  wa_ref, ba_ref,
                  wq_ref, bq_ref,
                  out_ref):
    # Matmul-operand dtype follows the stored weights (f32 or bf16); all
    # elementwise math (bias add, LayerNorm, ReLU, q-head reduce) stays f32.
    mm_dtype = w1_ref.dtype

    state = state_ref[...].astype(mm_dtype)
    action = action_ref[...].astype(mm_dtype)

    # fc1 -> ln1 -> relu
    x = jnp.dot(state, w1_ref[...], preferred_element_type=jnp.float32) + b1_ref[...]
    x = _layernorm(x, g1_ref[...], be1_ref[...])
    x = jnp.maximum(x, 0.0)

    # fc2 -> ln2
    x = jnp.dot(x.astype(mm_dtype), w2_ref[...],
                preferred_element_type=jnp.float32) + b2_ref[...]
    x = _layernorm(x, g2_ref[...], be2_ref[...])

    # action branch
    av = jnp.dot(action, wa_ref[...], preferred_element_type=jnp.float32) + ba_ref[...]

    # combine + relu
    sa = jnp.maximum(x + av, 0.0)                                   # [TB, fc2] f32

    # q head: fc2 -> 1 as VPU multiply + lane reduction (avoids a width-1 MXU
    # matmul that would use 1/128..1/256 of the MXU tile).  wq is a [1, fc2] row.
    q = jnp.sum(sa * wq_ref[...], axis=-1, keepdims=True) + bq_ref[...]   # [TB, 1]

    # Lane-dense store: broadcast q across the 128-wide padded output block so
    # the writeback is full unmasked vector stores; wrapper slices column 0.
    out_ref[...] = jnp.broadcast_to(q, out_ref.shape).astype(out_ref.dtype)


def critic_forward(state, action, params, *, block_batch=None):
    """state: [B, input_dim] f32, action: [B, n_actions] f32 -> [B, 1] f32."""
    B, input_dim = state.shape
    n_actions = action.shape[1]
    fc1 = params["w1"].shape[1]
    fc2 = params["w2"].shape[1]

    # Batch tile: multiple of 8 sublanes; capped for the smallest-VMEM
    # generation (v7x: 64 MiB physical, 32 MiB default scoped limit).
    if block_batch is None:
        block_batch = min(512, _round_up(B, 8))
    assert block_batch % 8 == 0, "batch tile must be a multiple of 8 sublanes"
    TB = block_batch

    # Pad batch to a whole number of tiles (padded rows sliced off afterwards).
    B_pad = TB * pl.cdiv(B, TB)
    if B_pad != B:
        state = jnp.pad(state, ((0, B_pad - B), (0, 0)))
        action = jnp.pad(action, ((0, B_pad - B), (0, 0)))

    args = (state, action,
            params["w1"], params["b1"], params["g1"], params["be1"],
            params["w2"], params["b2"], params["g2"], params["be2"],
            params["wa"], params["ba"],
            params["wq"], params["bq"])

    def tiled(feat):       # per-batch-tile blocks
        return pl.BlockSpec((TB, feat), lambda i: (i, 0))

    def resident(shape):   # same block every step -> stays VMEM-resident
        return pl.BlockSpec(shape, lambda i: (0, 0))

    in_specs = [tiled(input_dim), tiled(n_actions)] + [resident(p.shape)
                                                       for p in args[2:]]
    out_specs = pl.BlockSpec((TB, OUT_LANES), lambda i: (i, 0))

    # Rough VMEM budget: double-buffered I/O tiles + resident params + a few
    # activation temporaries; clamp to [32 MiB, 64 MiB] (v7x physical = 64 MiB).
    param_bytes = sum(int(p.size) * p.dtype.itemsize for p in args[2:])
    io_bytes = 2 * TB * (input_dim + n_actions + OUT_LANES) * 4
    act_bytes = 6 * TB * max(fc1, fc2, OUT_LANES) * 4
    vmem_limit = int(min(max(2 * (io_bytes + param_bytes + act_bytes),
                             32 * 1024 * 1024), 64 * 1024 * 1024))

    flops = 2 * B_pad * (input_dim * fc1 + fc1 * fc2 + n_actions * fc2 + fc2)
    bytes_accessed = (state.size + action.size + B_pad * OUT_LANES) * 4 + param_bytes
    cost = pl.CostEstimate(flops=flops,
                           transcendentals=2 * B_pad,          # rsqrt per row per LN
                           bytes_accessed=bytes_accessed)

    out_padded = pl.pallas_call(
        critic_kernel,
        out_shape=jax.ShapeDtypeStruct((B_pad, OUT_LANES), jnp.float32),
        grid=(B_pad // TB,),
        in_specs=in_specs,
        out_specs=out_specs,
        compiler_params=pltpu.CompilerParams(
            dimension_semantics=("parallel",),   # v7x: shard batch tiles over 2 TCs
            vmem_limit_bytes=vmem_limit),
        cost_estimate=cost,
    )(*args)

    return out_padded[:B, :1]


def init_params(key, input_dim, fc1_dims, fc2_dims, n_actions,
                weight_dtype=jnp.float32):
    """Deterministic init mirroring the PyTorch __init__ uniform bounds.

    Weight matrices are stored pre-transposed as [in, out]; the q-head weight
    is stored as a [1, fc2] row (used by the VPU multiply-reduce).  The three
    MXU-matmul weights may be bf16 (v6e/v7x); biases / LN params stay f32.
    """
    ks = jax.random.split(key, 8)

    def u(k, shape, bound, dtype=jnp.float32):
        return jax.random.uniform(k, shape, jnp.float32, -bound, bound).astype(dtype)

    fan1 = fc1_dims ** -0.5     # torch: fc1.weight.size()[0] == out_features
    fan2 = fc2_dims ** -0.5
    f3 = 0.003
    f4 = fc2_dims ** -0.5       # action_in.weight.size()[0] == fc2_dims

    return {
        "w1": u(ks[0], (input_dim, fc1_dims), fan1, weight_dtype),
        "b1": u(ks[1], (1, fc1_dims), fan1),
        "g1": jnp.ones((1, fc1_dims), jnp.float32),
        "be1": jnp.zeros((1, fc1_dims), jnp.float32),
        "w2": u(ks[2], (fc1_dims, fc2_dims), fan2, weight_dtype),
        "b2": u(ks[3], (1, fc2_dims), fan2),
        "g2": jnp.ones((1, fc2_dims), jnp.float32),
        "be2": jnp.zeros((1, fc2_dims), jnp.float32),
        "wa": u(ks[4], (n_actions, fc2_dims), f4, weight_dtype),
        "ba": u(ks[5], (1, fc2_dims), f4),
        "wq": u(ks[6], (1, fc2_dims), f3),          # q-head weight as a row
        "bq": u(ks[7], (1, 1), f3),
    }


def critic_ref(state, action, p):
    """Pure-JAX f32 reference for correctness check."""
    def ln(x, g, b):
        mu = jnp.mean(x, -1, keepdims=True)
        var = jnp.mean((x - mu) ** 2, -1, keepdims=True)
        return (x - mu) / jnp.sqrt(var + LN_EPS) * g + b
    f32 = lambda a: a.astype(jnp.float32)
    x = state @ f32(p["w1"]) + p["b1"]
    x = jnp.maximum(ln(x, p["g1"], p["be1"]), 0.0)
    x = x @ f32(p["w2"]) + p["b2"]
    x = ln(x, p["g2"], p["be2"])
    av = action @ f32(p["wa"]) + p["ba"]
    sa = jnp.maximum(x + av, 0.0)
    return jnp.sum(sa * f32(p["wq"]), -1, keepdims=True) + p["bq"]


if __name__ == "__main__":
    key = jax.random.PRNGKey(0)
    k_state, k_action, k_params = jax.random.split(key, 3)

    B, INPUT_DIM, FC1, FC2, N_ACTIONS = 64, 16, 64, 32, 4

    state = jax.random.normal(k_state, (B, INPUT_DIM), jnp.float32)
    action = jax.random.normal(k_action, (B, N_ACTIONS), jnp.float32)
    params = init_params(k_params, INPUT_DIM, FC1, FC2, N_ACTIONS)

    ref = critic_ref(state, action, params)

    # f32 weights: tight check (2 batch tiles -> exercises the grid pipeline).
    out = jax.block_until_ready(critic_forward(state, action, params,
                                               block_batch=32))
    assert out.shape == (B, 1), out.shape
    assert jnp.allclose(out, ref, atol=1e-4, rtol=1e-4), (out, ref)

    # bf16 matmul-operand path (v6e/v7x): only the three MXU weights are bf16;
    # LayerNorm / ReLU / bias / q-head math stay f32.  Looser tolerance.
    params_bf16 = dict(params)
    for name in ("w1", "w2", "wa"):
        params_bf16[name] = params[name].astype(jnp.bfloat16)
    out_bf16 = jax.block_until_ready(critic_forward(state, action, params_bf16,
                                                    block_batch=32))
    assert out_bf16.shape == (B, 1), out_bf16.shape
    assert jnp.allclose(out_bf16, ref, atol=2e-2, rtol=2e-2), (out_bf16, ref)

    print("KERNEL_OK")
</pallas_src>

<mosaic_0001>
module attributes {stable_mosaic.version = 11 : i64} {
  func.func @critic_kernel(%arg0: i32, %arg1: memref<32x16xf32, #tpu.memory_space<vmem>>, %arg2: memref<32x4xf32, #tpu.memory_space<vmem>>, %arg3: memref<16x64xf32, #tpu.memory_space<vmem>>, %arg4: memref<1x64xf32, #tpu.memory_space<vmem>>, %arg5: memref<1x64xf32, #tpu.memory_space<vmem>>, %arg6: memref<1x64xf32, #tpu.memory_space<vmem>>, %arg7: memref<64x32xf32, #tpu.memory_space<vmem>>, %arg8: memref<1x32xf32, #tpu.memory_space<vmem>>, %arg9: memref<1x32xf32, #tpu.memory_space<vmem>>, %arg10: memref<1x32xf32, #tpu.memory_space<vmem>>, %arg11: memref<4x32xf32, #tpu.memory_space<vmem>>, %arg12: memref<1x32xf32, #tpu.memory_space<vmem>>, %arg13: memref<1x32xf32, #tpu.memory_space<vmem>>, %arg14: memref<1x1xf32, #tpu.memory_space<vmem>>, %arg15: memref<32x128xf32, #tpu.memory_space<vmem>>) attributes {dimension_semantics = [#tpu.dimension_semantics<parallel>], iteration_bounds = array<i64: 2>, scalar_prefetch = 0 : i64, scratch_operands = 0 : i64, tpu.core_type = #tpu.core_type<tc>, window_params = [{transform_indices = @transform_0, window_bounds = array<i64: 32, 16>}, {transform_indices = @transform_1, window_bounds = array<i64: 32, 4>}, {pipeline_mode = #tpu.pipeline_mode<synchronous>, transform_indices = @transform_2, window_bounds = array<i64: 16, 64>}, {pipeline_mode = #tpu.pipeline_mode<synchronous>, transform_indices = @transform_3, window_bounds = array<i64: 1, 64>}, {pipeline_mode = #tpu.pipeline_mode<synchronous>, transform_indices = @transform_4, window_bounds = array<i64: 1, 64>}, {pipeline_mode = #tpu.pipeline_mode<synchronous>, transform_indices = @transform_5, window_bounds = array<i64: 1, 64>}, {pipeline_mode = #tpu.pipeline_mode<synchronous>, transform_indices = @transform_6, window_bounds = array<i64: 64, 32>}, {pipeline_mode = #tpu.pipeline_mode<synchronous>, transform_indices = @transform_7, window_bounds = array<i64: 1, 32>}, {pipeline_mode = #tpu.pipeline_mode<synchronous>, transform_indices = @transform_8, window_bounds = array<i64: 1, 32>}, {pipeline_mode = #tpu.pipeline_mode<synchronous>, transform_indices = @transform_9, window_bounds = array<i64: 1, 32>}, {pipeline_mode = #tpu.pipeline_mode<synchronous>, transform_indices = @transform_10, window_bounds = array<i64: 4, 32>}, {pipeline_mode = #tpu.pipeline_mode<synchronous>, transform_indices = @transform_11, window_bounds = array<i64: 1, 32>}, {pipeline_mode = #tpu.pipeline_mode<synchronous>, transform_indices = @transform_12, window_bounds = array<i64: 1, 32>}, {pipeline_mode = #tpu.pipeline_mode<synchronous>, transform_indices = @transform_13, window_bounds = array<i64: 1, 1>}, {transform_indices = @transform_14, window_bounds = array<i64: 32, 128>}]} {
    %c0 = arith.constant 0 : index
    %c0_0 = arith.constant 0 : index
    %0 = vector.load %arg1[%c0, %c0_0] : memref<32x16xf32, #tpu.memory_space<vmem>>, vector<32x16xf32>
    %c0_1 = arith.constant 0 : index
    %c0_2 = arith.constant 0 : index
    %1 = vector.load %arg2[%c0_1, %c0_2] : memref<32x4xf32, #tpu.memory_space<vmem>>, vector<32x4xf32>
    %c0_3 = arith.constant 0 : index
    %c0_4 = arith.constant 0 : index
    %2 = vector.load %arg3[%c0_3, %c0_4] : memref<16x64xf32, #tpu.memory_space<vmem>>, vector<16x64xf32>
    %cst = arith.constant dense<0.000000e+00> : vector<32x64xf32>
    %3 = tpu.matmul %0, %2, %cst {dimension_numbers = #tpu.dot_dimension_numbers<[1], [0], [0], [1], [0, 0, 1, 1], [], []>} : vector<32x16xf32>, vector<16x64xf32>, vector<32x64xf32> -> vector<32x64xf32>
    %c0_5 = arith.constant 0 : index
    %c0_6 = arith.constant 0 : index
    %4 = vector.load %arg4[%c0_5, %c0_6] : memref<1x64xf32, #tpu.memory_space<vmem>>, vector<1x64xf32>
    %5 = vector.broadcast %4 : vector<1x64xf32> to vector<32x64xf32>
    %6 = arith.addf %3, %5 : vector<32x64xf32>
    %c0_7 = arith.constant 0 : index
    %c0_8 = arith.constant 0 : index
    %7 = vector.load %arg5[%c0_7, %c0_8] : memref<1x64xf32, #tpu.memory_space<vmem>>, vector<1x64xf32>
    %c0_9 = arith.constant 0 : index
    %c0_10 = arith.constant 0 : index
    %8 = vector.load %arg6[%c0_9, %c0_10] : memref<1x64xf32, #tpu.memory_space<vmem>>, vector<1x64xf32>
    %cst_11 = arith.constant dense<0.000000e+00> : vector<32xf32>
    %9 = vector.multi_reduction <add>, %6, %cst_11 [1] : vector<32x64xf32> to vector<32xf32>
    %10 = vector.shape_cast %9 : vector<32xf32> to vector<32x1xf32>
    %cst_12 = arith.constant 6.400000e+01 : f32
    %11 = vector.broadcast %cst_12 : f32 to vector<32x1xf32>
    %12 = arith.divf %10, %11 : vector<32x1xf32>
    %13 = vector.broadcast %12 : vector<32x1xf32> to vector<32x64xf32>
    %14 = arith.subf %6, %13 : vector<32x64xf32>
    %15 = vector.broadcast %12 : vector<32x1xf32> to vector<32x64xf32>
    %16 = arith.subf %6, %15 : vector<32x64xf32>
    %17 = arith.mulf %14, %16 : vector<32x64xf32>
    %cst_13 = arith.constant dense<0.000000e+00> : vector<32xf32>
    %18 = vector.multi_reduction <add>, %17, %cst_13 [1] : vector<32x64xf32> to vector<32xf32>
    %19 = vector.shape_cast %18 : vector<32xf32> to vector<32x1xf32>
    %cst_14 = arith.constant 6.400000e+01 : f32
    %20 = vector.broadcast %cst_14 : f32 to vector<32x1xf32>
    %21 = arith.divf %19, %20 : vector<32x1xf32>
    %22 = vector.broadcast %12 : vector<32x1xf32> to vector<32x64xf32>
    %23 = arith.subf %6, %22 : vector<32x64xf32>
    %cst_15 = arith.constant 9.99999974E-6 : f32
    %24 = vector.broadcast %cst_15 : f32 to vector<32x1xf32>
    %25 = arith.addf %21, %24 : vector<32x1xf32>
    %26 = math.rsqrt %25 : vector<32x1xf32>
    %27 = vector.broadcast %26 : vector<32x1xf32> to vector<32x64xf32>
    %28 = arith.mulf %23, %27 : vector<32x64xf32>
    %29 = vector.broadcast %7 : vector<1x64xf32> to vector<32x64xf32>
    %30 = arith.mulf %28, %29 : vector<32x64xf32>
    %31 = vector.broadcast %8 : vector<1x64xf32> to vector<32x64xf32>
    %32 = arith.addf %30, %31 : vector<32x64xf32>
    %cst_16 = arith.constant 0.000000e+00 : f32
    %33 = vector.broadcast %cst_16 : f32 to vector<32x64xf32>
    %34 = arith.maximumf %32, %33 : vector<32x64xf32>
    %c0_17 = arith.constant 0 : index
    %c0_18 = arith.constant 0 : index
    %35 = vector.load %arg7[%c0_17, %c0_18] : memref<64x32xf32, #tpu.memory_space<vmem>>, vector<64x32xf32>
    %cst_19 = arith.constant dense<0.000000e+00> : vector<32x32xf32>
    %36 = tpu.matmul %34, %35, %cst_19 {dimension_numbers = #tpu.dot_dimension_numbers<[1], [0], [0], [1], [0, 0, 1, 1], [], []>} : vector<32x64xf32>, vector<64x32xf32>, vector<32x32xf32> -> vector<32x32xf32>
    %c0_20 = arith.constant 0 : index
    %c0_21 = arith.constant 0 : index
    %37 = vector.load %arg8[%c0_20, %c0_21] : memref<1x32xf32, #tpu.memory_space<vmem>>, vector<1x32xf32>
    %38 = vector.broadcast %37 : vector<1x32xf32> to vector<32x32xf32>
    %39 = arith.addf %36, %38 : vector<32x32xf32>
    %c0_22 = arith.constant 0 : index
    %c0_23 = arith.constant 0 : index
    %40 = vector.load %arg9[%c0_22, %c0_23] : memref<1x32xf32, #tpu.memory_space<vmem>>, vector<1x32xf32>
    %c0_24 = arith.constant 0 : index
    %c0_25 = arith.constant 0 : index
    %41 = vector.load %arg10[%c0_24, %c0_25] : memref<1x32xf32, #tpu.memory_space<vmem>>, vector<1x32xf32>
    %cst_26 = arith.constant dense<0.000000e+00> : vector<32xf32>
    %42 = vector.multi_reduction <add>, %39, %cst_26 [1] : vector<32x32xf32> to vector<32xf32>
    %43 = vector.shape_cast %42 : vector<32xf32> to vector<32x1xf32>
    %cst_27 = arith.constant 3.200000e+01 : f32
    %44 = vector.broadcast %cst_27 : f32 to vector<32x1xf32>
    %45 = arith.divf %43, %44 : vector<32x1xf32>
    %46 = vector.broadcast %45 : vector<32x1xf32> to vector<32x32xf32>
    %47 = arith.subf %39, %46 : vector<32x32xf32>
    %48 = vector.broadcast %45 : vector<32x1xf32> to vector<32x32xf32>
    %49 = arith.subf %39, %48 : vector<32x32xf32>
    %50 = arith.mulf %47, %49 : vector<32x32xf32>
    %cst_28 = arith.constant dense<0.000000e+00> : vector<32xf32>
    %51 = vector.multi_reduction <add>, %50, %cst_28 [1] : vector<32x32xf32> to vector<32xf32>
    %52 = vector.shape_cast %51 : vector<32xf32> to vector<32x1xf32>
    %cst_29 = arith.constant 3.200000e+01 : f32
    %53 = vector.broadcast %cst_29 : f32 to vector<32x1xf32>
    %54 = arith.divf %52, %53 : vector<32x1xf32>
    %55 = vector.broadcast %45 : vector<32x1xf32> to vector<32x32xf32>
    %56 = arith.subf %39, %55 : vector<32x32xf32>
    %cst_30 = arith.constant 9.99999974E-6 : f32
    %57 = vector.broadcast %cst_30 : f32 to vector<32x1xf32>
    %58 = arith.addf %54, %57 : vector<32x1xf32>
    %59 = math.rsqrt %58 : vector<32x1xf32>
    %60 = vector.broadcast %59 : vector<32x1xf32> to vector<32x32xf32>
    %61 = arith.mulf %56, %60 : vector<32x32xf32>
    %62 = vector.broadcast %40 : vector<1x32xf32> to vector<32x32xf32>
    %63 = arith.mulf %61, %62 : vector<32x32xf32>
    %64 = vector.broadcast %41 : vector<1x32xf32> to vector<32x32xf32>
    %65 = arith.addf %63, %64 : vector<32x32xf32>
    %c0_31 = arith.constant 0 : index
    %c0_32 = arith.constant 0 : index
    %66 = vector.load %arg11[%c0_31, %c0_32] : memref<4x32xf32, #tpu.memory_space<vmem>>, vector<4x32xf32>
    %cst_33 = arith.constant dense<0.000000e+00> : vector<32x32xf32>
    %67 = tpu.matmul %1, %66, %cst_33 {dimension_numbers = #tpu.dot_dimension_numbers<[1], [0], [0], [1], [0, 0, 1, 1], [], []>} : vector<32x4xf32>, vector<4x32xf32>, vector<32x32xf32> -> vector<32x32xf32>
    %c0_34 = arith.constant 0 : index
    %c0_35 = arith.constant 0 : index
    %68 = vector.load %arg12[%c0_34, %c0_35] : memref<1x32xf32, #tpu.memory_space<vmem>>, vector<1x32xf32>
    %69 = vector.broadcast %68 : vector<1x32xf32> to vector<32x32xf32>
    %70 = arith.addf %67, %69 : vector<32x32xf32>
    %71 = arith.addf %65, %70 : vector<32x32xf32>
    %cst_36 = arith.constant 0.000000e+00 : f32
    %72 = vector.broadcast %cst_36 : f32 to vector<32x32xf32>
    %73 = arith.maximumf %71, %72 : vector<32x32xf32>
    %c0_37 = arith.constant 0 : index
    %c0_38 = arith.constant 0 : index
    %74 = vector.load %arg13[%c0_37, %c0_38] : memref<1x32xf32, #tpu.memory_space<vmem>>, vector<1x32xf32>
    %75 = vector.broadcast %74 : vector<1x32xf32> to vector<32x32xf32>
    %76 = arith.mulf %73, %75 : vector<32x32xf32>
    %cst_39 = arith.constant dense<0.000000e+00> : vector<32xf32>
    %77 = vector.multi_reduction <add>, %76, %cst_39 [1] : vector<32x32xf32> to vector<32xf32>
    %78 = vector.shape_cast %77 : vector<32xf32> to vector<32x1xf32>
    %c0_40 = arith.constant 0 : index
    %c0_41 = arith.constant 0 : index
    %79 = vector.load %arg14[%c0_40, %c0_41] : memref<1x1xf32, #tpu.memory_space<vmem>>, vector<1x1xf32>
    %80 = vector.broadcast %79 : vector<1x1xf32> to vector<32x1xf32>
    %81 = arith.addf %78, %80 : vector<32x1xf32>
    %82 = vector.shape_cast %81 : vector<32x1xf32> to vector<32x1xf32>
    %83 = vector.broadcast %82 : vector<32x1xf32> to vector<32x128xf32>
    %c0_42 = arith.constant 0 : index
    %c0_43 = arith.constant 0 : index
    %84 = vector.load %arg15[%c0_42, %c0_43] : memref<32x128xf32, #tpu.memory_space<vmem>>, vector<32x128xf32>
    tpu.vector_store %arg15[%c0_42, %c0_43], %83 {strides = array<i32>} : memref<32x128xf32, #tpu.memory_space<vmem>>, vector<32x128xf32>,
    return
  }
  func.func @transform_0(%arg0: i32) -> (i32, i32) {
    %c0_i32 = arith.constant 0 : i32
    %c0_i32_0 = arith.constant 0 : i32
    return %arg0, %c0_i32 : i32, i32
  }
  func.func @transform_1(%arg0: i32) -> (i32, i32) {
    %c0_i32 = arith.constant 0 : i32
    %c0_i32_0 = arith.constant 0 : i32
    return %arg0, %c0_i32 : i32, i32
  }
  func.func @transform_2(%arg0: i32) -> (i32, i32) {
    %c0_i32 = arith.constant 0 : i32
    %c0_i32_0 = arith.constant 0 : i32
    %c0_i32_1 = arith.constant 0 : i32
    return %c0_i32, %c0_i32_0 : i32, i32
  }
  func.func @transform_3(%arg0: i32) -> (i32, i32) {
    %c0_i32 = arith.constant 0 : i32
    %c0_i32_0 = arith.constant 0 : i32
    %c0_i32_1 = arith.constant 0 : i32
    return %c0_i32, %c0_i32_0 : i32, i32
  }
  func.func @transform_4(%arg0: i32) -> (i32, i32) {
    %c0_i32 = arith.constant 0 : i32
    %c0_i32_0 = arith.constant 0 : i32
    %c0_i32_1 = arith.constant 0 : i32
    return %c0_i32, %c0_i32_0 : i32, i32
  }
  func.func @transform_5(%arg0: i32) -> (i32, i32) {
    %c0_i32 = arith.constant 0 : i32
    %c0_i32_0 = arith.constant 0 : i32
    %c0_i32_1 = arith.constant 0 : i32
    return %c0_i32, %c0_i32_0 : i32, i32
  }
  func.func @transform_6(%arg0: i32) -> (i32, i32) {
    %c0_i32 = arith.constant 0 : i32
    %c0_i32_0 = arith.constant 0 : i32
    %c0_i32_1 = arith.constant 0 : i32
    return %c0_i32, %c0_i32_0 : i32, i32
  }
  func.func @transform_7(%arg0: i32) -> (i32, i32) {
    %c0_i32 = arith.constant 0 : i32
    %c0_i32_0 = arith.constant 0 : i32
    %c0_i32_1 = arith.constant 0 : i32
    return %c0_i32, %c0_i32_0 : i32, i32
  }
  func.func @transform_8(%arg0: i32) -> (i32, i32) {
    %c0_i32 = arith.constant 0 : i32
    %c0_i32_0 = arith.constant 0 : i32
    %c0_i32_1 = arith.constant 0 : i32
    return %c0_i32, %c0_i32_0 : i32, i32
  }
  func.func @transform_9(%arg0: i32) -> (i32, i32) {
    %c0_i32 = arith.constant 0 : i32
    %c0_i32_0 = arith.constant 0 : i32
    %c0_i32_1 = arith.constant 0 : i32
    return %c0_i32, %c0_i32_0 : i32, i32
  }
  func.func @transform_10(%arg0: i32) -> (i32, i32) {
    %c0_i32 = arith.constant 0 : i32
    %c0_i32_0 = arith.constant 0 : i32
    %c0_i32_1 = arith.constant 0 : i32
    return %c0_i32, %c0_i32_0 : i32, i32
  }
  func.func @transform_11(%arg0: i32) -> (i32, i32) {
    %c0_i32 = arith.constant 0 : i32
    %c0_i32_0 = arith.constant 0 : i32
    %c0_i32_1 = arith.constant 0 : i32
    return %c0_i32, %c0_i32_0 : i32, i32
  }
  func.func @transform_12(%arg0: i32) -> (i32, i32) {
    %c0_i32 = arith.constant 0 : i32
    %c0_i32_0 = arith.constant 0 : i32
    %c0_i32_1 = arith.constant 0 : i32
    return %c0_i32, %c0_i32_0 : i32, i32
  }
  func.func @transform_13(%arg0: i32) -> (i32, i32) {
    %c0_i32 = arith.constant 0 : i32
    %c0_i32_0 = arith.constant 0 : i32
    %c0_i32_1 = arith.constant 0 : i32
    return %c0_i32, %c0_i32_0 : i32, i32
  }
  func.func @transform_14(%arg0: i32) -> (i32, i32) {
    %c0_i32 = arith.constant 0 : i32
    %c0_i32_0 = arith.constant 0 : i32
    return %arg0, %c0_i32 : i32, i32
  }
}

</mosaic_0001>

<bundles_post_ra>
// kernel: tpu_custom_call.1
= control target key start
LH: loop header
LB: loop body
LE: loop exit
PB: predicated region body
PF: predicated region fallthrough
CT: control target
= control target key end

     0   :  { %s1656_s0 = inlined_call_operand.vmem [shape: f32[64,16], index: 0, kind: input, shape index: {}]   ;;  %s1657_s1 = inlined_call_operand.vmem [shape: f32[64,4], index: 1, kind: input, shape index: {}]   ;;  %s1658_s2 = inlined_call_operand.vmem [shape: f32[16,64], index: 2, kind: input, shape index: {}]   ;;  %s1659_s3 = inlined_call_operand.vmem [shape: f32[1,64], index: 3, kind: input, shape index: {}]   ;;  %s1660_s4 = inlined_call_operand.vmem [shape: f32[1,64], index: 4, kind: input, shape index: {}]   ;;  %s1661_s5 = inlined_call_operand.vmem [shape: f32[1,64], index: 5, kind: input, shape index: {}]   ;;  %s1662_s6 = inlined_call_operand.vmem [shape: f32[64,32], index: 6, kind: input, shape index: {}]   ;;  %s1663_s7 = inlined_call_operand.vmem [shape: f32[1,32], index: 7, kind: input, shape index: {}]   ;;  %s1664_s8 = inlined_call_operand.vmem [shape: f32[1,32], index: 8, kind: input, shape index: {}]   ;;  %s1665_s9 = inlined_call_operand.vmem [shape: f32[1,32], index: 9, kind: input, shape index: {}]   ;;  %s1666_s10 = inlined_call_operand.vmem [shape: f32[4,32], index: 10, kind: input, shape index: {}]   ;;  %s1667_s11 = inlined_call_operand.vmem [shape: f32[1,32], index: 11, kind: input, shape index: {}]   ;;  %s1668_s12 = inlined_call_operand.vmem [shape: f32[1,32], index: 12, kind: input, shape index: {}]   ;;  %s1669_s13 = inlined_call_operand.<no memory space> [shape: f32[1,1], index: 13, kind: input, shape index: {}]   ;;  %s1670_s14 = inlined_call_operand.hbm [shape: f32[64,128], index: 14, kind: output, shape index: {}]  }
   0x1   :  { %1672 = sst [smem:[#allocation6_spill]] %s1656_s0  ;;  %v19_v0 = vstv %s1669_s13 }
   0x2   :  { %1673 = sst [smem:[#allocation7_spill]] %s1657_s1  ;;  %20 = vst [vmem:[#allocation2] sm:$0x1] %v19_v0 }
   0x3   :  { %1674 = sst [smem:[#allocation8_spill]] %s1658_s2 }
   0x4   :  { %21 = vsyncpa [#allocation4], 0 }
   0x5   :  { %23 = vsyncpa [#allocation4 + $0x1], 0  ;;  %s1444_s15 = smov 0   ;;  %s1446_s16 = smov 0  }
   0x6   :  { %s1448_s17 = smov 0   ;;  %s1450_s18 = smov 0  }
   0x7 LB: > { %s1465_s13 = sadd.s32 4294967295, %s1360_s18   ;;  %s1140_s19 = sadd.s32 4294967294, %s1360_s18   ;;  %s1360_s18 = sphi %s1450_s18, %s1684_s18   ;;  %s1356_s17 = sphi %s1448_s17, %s1683_s17   ;;  %s1352_s16 = sphi %s1446_s16, %s1682_s16   ;;  %s1348_s15 = sphi %s1444_s15, %s1681_s15  }
   0x8   : > { %s1469_s20 = sadd.s32 1, %s1360_s18   ;;  %s340_s21 = sadd.s32 1, %s1356_s17 }
   0x9   : > { %s337_s22 = ssub.s32 %s1360_s18, %s1469_s20  ;;  %p350_p0 = scmp.ne.s32.totalorder %s1356_s17, %s1352_s16 }
   0xa   : > { %p338_p1 = scmp.eq.s32.totalorder %s337_s22, 0  ;;  %p351_p2 = scmp.eq.s32.totalorder %s1465_s13, 1 }
   0xb   : > { %p356_p3 = scmp.ne.s32.totalorder %s1352_s16, %s1348_s15  ;;  %p357_p4 = scmp.eq.s32.totalorder %s1140_s19, 1 }
   0xc   : > { %s1480_s23 = scalar_select %p338_p1, %s1356_s17, %s340_s21  }
   0xd   : > { %p1482_p5 = por %p351_p2, %p350_p0  ;;  %p1486_p6 = por %p357_p4, %p356_p3 }
   0xe   : > { %p1143_p7 = scmp.ge.s32.totalorder %s1360_s18, 1  ;;  %p429_p8 = scmp.lt.s32.totalorder %s1360_s18, 3 }
  0x10   : > { %p430_p9 = pnand %p1143_p7, %p429_p8 }
  0x11   : > { %s1677_s2 = sld [smem:[#allocation8_spill]] (!%p430_p9)  ;;  %s1145_s30 = sshll.u32 (!%p430_p9), %s1465_s13, 2 }
  0x12   : > { %433 = sbr.rel (%p430_p9) target bundleno = 1337 (0x539), region = 76  ;;  %p481_p10 = scmp.lt.s32.totalorder (!%p430_p9), %s1145_s30, 7 }
  0x13   : > { %s1678_s0 = sld [smem:[#allocation6_spill]] (!%p430_p9)  ;;  %s477_s22 = sand.u32 (!%p430_p9), 1, %s1352_s16  }
  0x14   : > { %s1680_s1 = sld [smem:[#allocation7_spill]] (!%p430_p9) }
  0x17   : > { %v502_v1 = vld [vmem:[%s1677_s2 + $0x8] sm:$0xff]  ;;  %v501_v2 = vld [vmem:[%s1677_s2] sm:$0xff]  ;;  %s1686_s30 = smov (!%p481_p10, %s1145_s30), 7  ;;  %vm510_vm0 = vcmask 130048   ;;  %vm610_vm1 = vcmask 523264   ;;  %v695_v40 = vld [vmem:[%s1662_s6 + $0x38] sm:$0xff] }
  0x18   : > { %1200 = vmatprep.subr.mxu0 %v502_v1  ;;  %s1671_s19 = sshll.u32 %s1686_s30, 3  ;;  %v1149_v8 = vld [vmem:[%s1659_s3] ss:$0 sm:$0xff]  ;;  %v694_v41 = vld [vmem:[%s1662_s6 + $0x30] sm:$0xff]  ;;  %1210 = vmatprep.subr.mxu1 %v695_v40  ;;  %v693_v42 = vld [vmem:[%s1662_s6 + $0x28] sm:$0xff]  ;;  %s1679_s27 = sshll.u32 %s1686_s30, 3 }
  0x19   : > { %1201 = vmatpush3.msra.mxu0 %v502_v1  ;;  %s484_s26 = scalar_lea.vmem %s1678_s0, %s1671_s19  ;;  %1211 = vmatpush3.msra.mxu1 %v695_v40  ;;  %v692_v43 = vld [vmem:[%s1662_s6 + $0x20] sm:$0xff]  ;;  %v691_v44 = vld [vmem:[%s1662_s6 + $0x18] sm:$0xff]  ;;  %v690_v45 = vld [vmem:[%s1662_s6 + $0x10] sm:$0xff]  ;;  %vm897_vm2 = vcmask 1043456   ;;  %vm884_vm3 = vcmask 31744   ;;  %vm802_vm4 = vcmask 261120  }
  0x1a   : > { %1202 = vmatprep.subr.mxu0 %v501_v2  ;;  %v493_v3 = vld [vmem:[%s484_s26] sm:$0xff]  ;;  %v494_v4 = vld [vmem:[%s484_s26 + $0x8] sm:$0xff]  ;;  %v495_v5 = vld [vmem:[%s484_s26 + $0x10] sm:$0xff]  ;;  %1212 = vmatprep.subr.mxu1 %v694_v41  ;;  %s490_s19 = scalar_lea.vmem %s1680_s1, %s1679_s27  ;;  %s1176_s0 = sshll.u32 %s1465_s13, 9 }
  0x1b   : > { %1203 = vmatpush3.msra.mxu0 %v501_v2  ;;  %1204 = vmatprep.mubr.msk.f32.mxu0 %vm510_vm0, %v493_v3  ;;  %v496_v6 = vld [vmem:[%s484_s26 + $0x18] sm:$0xff]  ;;  %v689_v46 = vld [vmem:[%s1662_s6 + $0x8] sm:$0xff]  ;;  %v688_v47 = vld [vmem:[%s1662_s6] sm:$0xff]  ;;  %s1144_s26 = sshll.u32 %s477_s22, 5  ;;  %s1614_s21 = scalar_lea.hbm %s1670_s14, %s1176_s0 }
  0x1c   : > { %1205 = vmatmul.mubr.msk.f32.vlgmr.msra.gmra.mxu0 %vm510_vm0, %v494_v4  ;;  %1213 = vmatpush3.msra.mxu1 %v694_v41  ;;  %v1154_v61 = vld [vmem:[%s1660_s4] ss:$0 sm:$0xff]  ;;  %s479_s27 = scalar_lea.vmem [#allocation3], %s1144_s26  ;;  %s1616_s30 = scalar_lea.sflag [#allocation4], %s477_s22 }
  0x1d   : > { %1207 = vmatprep.mubr.msk.f32.mxu0 %vm510_vm0, %v495_v5  ;;  %1214 = vmatprep.subr.mxu1 %v693_v42  ;;  %v1155_v63 = vld [vmem:[%s1661_s5] ss:$0 sm:$0xff]  ;;  %s1066_s28 = sshll.u32 %s479_s27, 4  ;;  %s1363_s13 = smov [#allocation3]   ;;  %s1609_s28 = int_to_ptr.vmem [resolvable:$true] %s1066_s28 }
  0x1e   : > { %1215 = vmatpush3.msra.mxu1 %v693_v42  ;;  %s1300_s26 = scalar_lea.vmem %s1609_s28, 512  ;;  %s1304_s1 = sshll.u32 %s1363_s13, 4  ;;  %s1305_s1 = int_to_ptr.vmem [resolvable:$false] %s1304_s1 }
  0x1f   : > { %1216 = vmatprep.subr.mxu1 %v692_v43  ;;  %p1301_p11 = scmp.ne.s32.totalorder %s1609_s28, %s1300_s26  ;;  %s1306_s2 = scalar_lea.vmem %s1305_s1, 1024 }
  0x20   : > { %1208 = vmatmul.mubr.msk.f32.gmra.mxu0 %vm510_vm0, %v496_v6  ;;  %1217 = vmatpush3.msra.mxu1 %v692_v43  ;;  %p1307_p0 = scmp.lt.s32.totalorder %s1609_s28, %s1305_s1  ;;  %p1308_p1 = scmp.lt.s32.totalorder %s1306_s2, %s1300_s26 }
  0x21   : > { %1218 = vmatprep.subr.mxu1 %v691_v44  ;;  %p1302_p12 = pnand %p1301_p11, %p1482_p5 }
  0x22   : > { %1219 = vmatpush3.msra.mxu1 %v691_v44  ;;  %p1309_p2 = por %p1308_p1, %p1307_p0 }
  0x23   : > { %1220 = vmatprep.subr.mxu1 %v690_v45  ;;  %p1303_p13 = pneg %p1302_p12 }
  0x24   : > { %1221 = vmatpush3.msra.mxu1 %v690_v45 }
  0x25   : > { %1222 = vmatprep.subr.mxu1 %v689_v46  ;;  %p1310_p3 = pnand %p1309_p2, %p1303_p13 }
  0x26   : > { %1223 = vmatpush3.msra.mxu1 %v689_v46 }
  0x27   : > { %1224 = vmatprep.subr.mxu1 %v688_v47 }
  0x28   : > { %1225 = vmatpush3.msra.mxu1 %v688_v47 }
  0xdc   : > { %v1206_v7 = vpop.f32.mrf.mxu0 }
  0xdd   : > { %v595_v12 = vadd.f32 %v1206_v7, %v1149_v8 }
  0xde   : > { %v589_v9 = vpop.f32.mrf.mxu0 }
  0xdf   : > { %v590_v10 = vadd.f32 %v1149_v8, %v589_v9  ;;  %v614_v18 = vsel %vm610_vm1, %v595_v12, 0.0 }
  0xe0   : > { %v1209_v11 = vpop.f32.mrf.mxu0 }
  0xe1   : > { %v611_v13 = vsel %vm610_vm1, %v590_v10, 0.0  ;;  %v605_v16 = vadd.f32 %v1209_v11, %v1149_v8 }
  0xe2   : > { %v599_v14 = vpop.f32.mrf.mxu0  ;;  %612 = vadd.xlane.f32.xlu0 %v611_v13 }
  0xe3   : > { %v600_v15 = vadd.f32 %v1149_v8, %v599_v14  ;;  %v620_v19 = vsel %vm610_vm1, %v605_v16, 0.0 }
  0xe5   : > { %v617_v17 = vsel %vm610_vm1, %v600_v15, 0.0 }
  0xe6   : > { %618 = vadd.xlane.f32.xlu1 %v617_v17  ;;  %615 = vadd.xlane.f32.xlu0 %v614_v18  ;;  %v876_v18 = vld [vmem:[%s1666_s10] sm:$0xf] }
  0xe7   : > { %1232 = vmatprep.subr.msk.mxu0 %vm897_vm2, %v876_v18 }
  0xe8   : > { %1233 = vmatpush3.msk.msra.mxu0 %vm897_vm2, %v876_v18 }
  0xea   : > { %621 = vadd.xlane.f32.xlu1 %v620_v19  ;;  %v497_v19 = vld [vmem:[%s490_s19] sm:$0xff] }
  0xeb   : > { %1234 = vmatprep.mubr.msk.f32.mxu0 %vm884_vm3, %v497_v19 }
 0x16b   : > { %v613_v20 = vpop.xlane.xlu0 %612 }
 0x16c   : > { %v624_v21 = vmul.f32 0.015625, %v613_v20  ;;  %v498_v20 = vld [vmem:[%s490_s19 + $0x8] sm:$0xff] }
 0x16d   : > { %1235 = vmatmul.mubr.msk.f32.vlgmr.msra.gmra.mxu0 %vm884_vm3, %v498_v20 }
 0x16e   : > { %v1514_v22 = vsub.f32 %v590_v10, %v624_v21  ;;  %v499_v21 = vld [vmem:[%s490_s19 + $0x10] sm:$0xff] }
 0x16f   : > { %v619_v23 = vpop.xlane.xlu1 %618  ;;  %v616_v24 = vpop.xlane.xlu0 %615  ;;  %1237 = vmatprep.mubr.msk.f32.mxu0 %vm884_vm3, %v499_v21 }
 0x170   : > { %v626_v25 = vmul.f32 0.015625, %v619_v23  ;;  %v625_v26 = vmul.f32 0.015625, %v616_v24  ;;  %v632_v27 = vmul.f32 %v1514_v22, %v1514_v22  ;;  %v1156_v23 = vld [vmem:[%s1663_s7] ss:$0 sm:$0xff] }
 0x172   : > { %v1518_v28 = vsub.f32 %v600_v15, %v626_v25  ;;  %v1520_v29 = vsub.f32 %v595_v12, %v625_v26  ;;  %v636_v30 = vsel %vm610_vm1, %v632_v27, 0.0 }
 0x173   : > { %v622_v31 = vpop.xlane.xlu1 %621  ;;  %637 = vadd.xlane.f32.xlu0 %v636_v30 }
 0x174   : > { %v627_v32 = vmul.f32 0.015625, %v622_v31  ;;  %v634_v33 = vmul.f32 %v1518_v28, %v1518_v28  ;;  %v633_v34 = vmul.f32 %v1520_v29, %v1520_v29 }
 0x176   : > { %v1527_v35 = vsub.f32 %v605_v16, %v627_v32  ;;  %v642_v36 = vsel %vm610_vm1, %v634_v33, 0.0  ;;  %v639_v37 = vsel %vm610_vm1, %v633_v34, 0.0 }
 0x177   : > { %643 = vadd.xlane.f32.xlu0 %v642_v36  ;;  %640 = vadd.xlane.f32.xlu1 %v639_v37 }
 0x178   : > { %v635_v38 = vmul.f32 %v1527_v35, %v1527_v35 }
 0x17a   : > { %v645_v39 = vsel %vm610_vm1, %v635_v38, 0.0 }
 0x17b   : > { %646 = vadd.xlane.f32.xlu1 %v645_v39 }
 0x1fc   : > { %v638_v48 = vpop.xlane.xlu0 %637 }
 0x1fd   : > { %v648_v49 = vmul.f32 0.015625, %v638_v48 }
 0x1ff   : > { %v652_v50 = vadd.f32 1e-05, %v648_v49 }
 0x200   : > { %v641_v51 = vpop.xlane.xlu1 %640  ;;  %v644_v52 = vpop.xlane.xlu0 %643 }
 0x201   : > { %1284 = vrsqrt.f32 %v652_v50  ;;  %v649_v53 = vmul.f32 0.015625, %v641_v51  ;;  %v650_v54 = vmul.f32 0.015625, %v644_v52 }
 0x203   : > { %v653_v55 = vadd.f32 1e-05, %v649_v53  ;;  %v654_v56 = vadd.f32 1e-05, %v650_v54 }
 0x204   : > { %v647_v57 = vpop.xlane.xlu1 %646 }
 0x205   : > { %1286 = vrsqrt.f32 %v653_v55  ;;  %v651_v58 = vmul.f32 0.015625, %v647_v57 }
 0x206   : > { %1288 = vrsqrt.f32 %v654_v56 }
 0x207   : > { %v655_v59 = vadd.f32 1e-05, %v651_v58 }
 0x209   : > { %1290 = vrsqrt.f32 %v655_v59 }
 0x20e   : > { %v1285_v60 = vpop.eup %1284 }
 0x20f   : > { %v660_v62 = vmul.f32 %v1285_v60, %v1514_v22  ;;  %v500_v22 = vld [vmem:[%s490_s19 + $0x18] sm:$0xff] }
 0x210   : > { %1238 = vmatmul.mubr.msk.f32.gmra.mxu0 %vm884_vm3, %v500_v22 }
 0x211   : > { %v670_v0 = vmul.f32 %v1154_v61, %v660_v62 }
 0x212   : > { %v1287_v1 = vpop.eup %1286 }
 0x213   : > { %v1289_v2 = vpop.eup %1288  ;;  %v680_v3 = vadd.f32 %v1155_v63, %v670_v0  ;;  %v661_v4 = vmul.f32 %v1287_v1, %v1520_v29 }
 0x214   : > { %v662_v5 = vmul.f32 %v1289_v2, %v1518_v28 }
 0x215   : > { %v684_v6 = vmax.f32 %v680_v3, 0.0  ;;  %v671_v7 = vmul.f32 %v1154_v61, %v661_v4 }
 0x216   : > { %v1291_v8 = vpop.eup %1290  ;;  %v672_v9 = vmul.f32 %v1154_v61, %v662_v5 }
 0x217   : > { %1226 = vmatprep.mubr.msk.f32.mxu1 %vm610_vm1, %v684_v6  ;;  %v681_v10 = vadd.f32 %v1155_v63, %v671_v7  ;;  %v663_v11 = vmul.f32 %v1291_v8, %v1527_v35  ;;  %v1161_v7 = vld [vmem:[%s1664_s8] ss:$0 sm:$0xff] }
 0x218   : > { %v682_v12 = vadd.f32 %v1155_v63, %v672_v9  ;;  %v1163_v8 = vld [vmem:[%s1667_s11] ss:$0 sm:$0xff] }
 0x219   : > { %v685_v13 = vmax.f32 %v681_v10, 0.0  ;;  %v673_v14 = vmul.f32 %v1154_v61, %v663_v11  ;;  %v1162_v11 = vld [vmem:[%s1665_s9] ss:$0 sm:$0xff] }
 0x21a   : > { %v686_v15 = vmax.f32 %v682_v12, 0.0 }
 0x21b   : > { %1227 = vmatmul.mubr.msk.f32.vlgmr.msra.gmra.mxu1 %vm610_vm1, %v685_v13  ;;  %v683_v16 = vadd.f32 %v1155_v63, %v673_v14 }
 0x21c   : > { %1229 = vmatprep.mubr.msk.f32.mxu1 %vm610_vm1, %v686_v15 }
 0x21d   : > { %v687_v17 = vmax.f32 %v683_v16, 0.0 }
 0x21f   : > { %1230 = vmatmul.mubr.msk.f32.gmra.mxu1 %vm610_vm1, %v687_v17 }
 0x22d   : > { %v1236_v4 = vpop.f32.mrf.mxu0 }
 0x22e   : > { %v973_v13 = vadd.f32 %v1236_v4, %v1163_v8 }
 0x22f   : > { %v967_v5 = vpop.f32.mrf.mxu0 }
 0x230   : > { %v968_v21 = vadd.f32 %v1163_v8, %v967_v5 }
 0x2d0   : > { %v1239_v15 = vpop.f32.mrf.mxu0 }
 0x2d1   : > { %v983_v22 = vadd.f32 %v1239_v15, %v1163_v8 }
 0x2db   : > { %v1228_v24 = vpop.f32.mrf.mxu1 }
 0x2dc   : > { %v787_v25 = vadd.f32 %v1228_v24, %v1156_v23 }
 0x2dd   : > { %v781_v26 = vpop.f32.mrf.mxu1 }
 0x2de   : > { %v782_v27 = vadd.f32 %v1156_v23, %v781_v26  ;;  %v806_v28 = vsel %vm802_vm4, %v787_v25, 0.0 }
 0x2df   : > { %807 = vadd.xlane.f32.xlu1 %v806_v28  ;;  %v1231_v29 = vpop.f32.mrf.mxu1  ;;  %v1169_v28 = vld [vmem:[%s1668_s12] ss:$0 sm:$0xff] }
 0x2e0   : > { %v797_v30 = vadd.f32 %v1231_v29, %v1156_v23  ;;  %v803_v31 = vsel %vm802_vm4, %v782_v27, 0.0 }
 0x2e1   : > { %804 = vadd.xlane.f32.xlu0 %v803_v31  ;;  %v791_v32 = vpop.f32.mrf.mxu1 }
 0x2e2   : > { %v792_v33 = vadd.f32 %v1156_v23, %v791_v32  ;;  %v812_v34 = vsel %vm802_vm4, %v797_v30, 0.0 }
 0x2e3   : > { %813 = vadd.xlane.f32.xlu1 %v812_v34 }
 0x2e4   : > { %v809_v35 = vsel %vm802_vm4, %v792_v33, 0.0 }
 0x2e5   : > { %810 = vadd.xlane.f32.xlu0 %v809_v35 }
 0x368   : > { %v808_v36 = vpop.xlane.xlu1 %807 }
 0x369   : > { %v817_v37 = vmul.f32 0.03125, %v808_v36 }
 0x36a   : > { %v805_v38 = vpop.xlane.xlu0 %804 }
 0x36b   : > { %v821_v39 = vsub.f32 %v787_v25, %v817_v37  ;;  %v816_v40 = vmul.f32 0.03125, %v805_v38 }
 0x36c   : > { %v814_v41 = vpop.xlane.xlu1 %813 }
 0x36d   : > { %v820_v42 = vsub.f32 %v782_v27, %v816_v40  ;;  %v819_v43 = vmul.f32 0.03125, %v814_v41  ;;  %v825_v44 = vmul.f32 %v821_v39, %v821_v39  ;;  %v977_v27 = vpop.f32.mrf.mxu0 }
 0x36e   : > { %v811_v45 = vpop.xlane.xlu0 %810 }
 0x36f   : > { %v823_v46 = vsub.f32 %v797_v30, %v819_v43  ;;  %v818_v47 = vmul.f32 0.03125, %v811_v45  ;;  %v831_v48 = vsel %vm802_vm4, %v825_v44, 0.0  ;;  %v824_v49 = vmul.f32 %v820_v42, %v820_v42 }
 0x370   : > { %832 = vadd.xlane.f32.xlu1 %v831_v48  ;;  %v1362_v48 = vmov 0  }
 0x371   : > { %v822_v50 = vsub.f32 %v792_v33, %v818_v47  ;;  %v828_v51 = vsel %vm802_vm4, %v824_v49, 0.0  ;;  %v827_v52 = vmul.f32 %v823_v46, %v823_v46  ;;  %v978_v33 = vadd.f32 %v1163_v8, %v977_v27  ;;  %1283 = vset.pattern.permute.xlu1 %v1362_v48  ;;  %1282 = vset.pattern.permute.xlu0 %v1362_v48  ;;  %v1170_v49 = vld [vmem:[#allocation2] ss:$0 sm:$0xff] }
 0x372   : > { %829 = vadd.xlane.f32.xlu0 %v828_v51 }
 0x373   : > { %v837_v53 = vsel %vm802_vm4, %v827_v52, 0.0  ;;  %v826_v54 = vmul.f32 %v822_v50, %v822_v50 }
 0x374   : > { %838 = vadd.xlane.f32.xlu1 %v837_v53 }
 0x375   : > { %v834_v55 = vsel %vm802_vm4, %v826_v54, 0.0 }
 0x376   : > { %835 = vadd.xlane.f32.xlu0 %v834_v55 }
 0x3f9   : > { %v833_v56 = vpop.xlane.xlu1 %832 }
 0x3fa   : > { %v841_v57 = vmul.f32 0.03125, %v833_v56 }
 0x3fb   : > { %v830_v58 = vpop.xlane.xlu0 %829 }
 0x3fc   : > { %v845_v59 = vadd.f32 1e-05, %v841_v57  ;;  %v840_v60 = vmul.f32 0.03125, %v830_v58 }
 0x3fd   : > { %v839_v61 = vpop.xlane.xlu1 %838 }
 0x3fe   : > { %1292 = vrsqrt.f32 %v845_v59  ;;  %v844_v62 = vadd.f32 1e-05, %v840_v60  ;;  %v843_v63 = vmul.f32 0.03125, %v839_v61 }
 0x3ff   : > { %v836_v0 = vpop.xlane.xlu0 %835 }
 0x400   : > { %1294 = vrsqrt.f32 %v844_v62  ;;  %v847_v1 = vadd.f32 1e-05, %v843_v63  ;;  %v842_v2 = vmul.f32 0.03125, %v836_v0 }
 0x402   : > { %1296 = vrsqrt.f32 %v847_v1  ;;  %v846_v3 = vadd.f32 1e-05, %v842_v2 }
 0x404   : > { %1298 = vrsqrt.f32 %v846_v3 }
 0x40b   : > { %v1293_v6 = vpop.eup %1292 }
 0x40c   : > { %v853_v9 = vmul.f32 %v1293_v6, %v821_v39 }
 0x40d   : > { %v1295_v10 = vpop.eup %1294 }
 0x40e   : > { %v863_v12 = vmul.f32 %v1161_v7, %v853_v9  ;;  %v852_v14 = vmul.f32 %v1295_v10, %v820_v42 }
 0x40f   : > { %v1297_v16 = vpop.eup %1296 }
 0x410   : > { %v873_v17 = vadd.f32 %v1162_v11, %v863_v12  ;;  %v862_v18 = vmul.f32 %v1161_v7, %v852_v14  ;;  %v855_v19 = vmul.f32 %v1297_v16, %v823_v46 }
 0x411   : > { %v1299_v20 = vpop.eup %1298 }
 0x412   : > { %v987_v23 = vadd.f32 %v973_v13, %v873_v17  ;;  %v872_v24 = vadd.f32 %v1162_v11, %v862_v18  ;;  %v865_v25 = vmul.f32 %v1161_v7, %v855_v19  ;;  %v854_v26 = vmul.f32 %v1299_v20, %v822_v50 }
 0x414   : > { %v991_v29 = vmax.f32 %v987_v23, 0.0  ;;  %v986_v30 = vadd.f32 %v968_v21, %v872_v24  ;;  %v875_v31 = vadd.f32 %v1162_v11, %v865_v25  ;;  %v864_v32 = vmul.f32 %v1161_v7, %v854_v26 }
 0x416   : > { %v990_v34 = vmax.f32 %v986_v30, 0.0  ;;  %v989_v35 = vadd.f32 %v983_v22, %v875_v31  ;;  %v874_v36 = vadd.f32 %v1162_v11, %v864_v32  ;;  %v1002_v37 = vmul.f32 %v1169_v28, %v991_v29 }
 0x418   : > { %v993_v38 = vmax.f32 %v989_v35, 0.0  ;;  %v988_v39 = vadd.f32 %v978_v33, %v874_v36  ;;  %v1008_v40 = vsel %vm802_vm4, %v1002_v37, 0.0  ;;  %v1001_v41 = vmul.f32 %v1169_v28, %v990_v34 }
 0x419   : > { %1009 = vadd.xlane.f32.xlu1 %v1008_v40 }
 0x41a   : > { %v992_v42 = vmax.f32 %v988_v39, 0.0  ;;  %v1005_v43 = vsel %vm802_vm4, %v1001_v41, 0.0  ;;  %v1004_v44 = vmul.f32 %v1169_v28, %v993_v38 }
 0x41b   : > { %1006 = vadd.xlane.f32.xlu0 %v1005_v43 }
 0x41c   : > { %v1014_v45 = vsel %vm802_vm4, %v1004_v44, 0.0  ;;  %v1003_v46 = vmul.f32 %v1169_v28, %v992_v42 }
 0x41d   : > { %1015 = vadd.xlane.f32.xlu1 %v1014_v45 }
 0x41e   : > { %v1011_v47 = vsel %vm802_vm4, %v1003_v46, 0.0 }
 0x41f   : > { %1012 = vadd.xlane.f32.xlu0 %v1011_v47 }
 0x4a2   : > { %v1010_v50 = vpop.xlane.xlu1 %1009 }
 0x4a3   : > { %v1025_v51 = vadd.f32 %v1170_v49, %v1010_v50 }
 0x4a4   : > { %v1007_v52 = vpop.xlane.xlu0 %1006 }
 0x4a5   : > { %v1024_v53 = vadd.f32 %v1170_v49, %v1007_v52  ;;  %1035 = vperm.xlu1 %1283, %v1025_v51  }
 0x4a6   : > { %v1016_v56 = vpop.xlane.xlu1 %1015 }
 0x4a7   : > { %1030 = vperm.xlu0 %1282, %v1024_v53   ;;  %v1027_v57 = vadd.f32 %v1170_v49, %v1016_v56 }
 0x4a8   : > { %v1013_v54 = vpop.xlane.xlu0 %1012 }
 0x4a9   : > { %v1026_v55 = vadd.f32 %v1170_v49, %v1013_v54 }
 0x4ab   : > { %1040 = vperm.xlu1 %1283, %v1026_v55  }
 0x4af   : > { %1045 = vperm.xlu1 %1283, %v1027_v57  }
 0x520   : > { %v1036_v58 = vpop.permute.xlu1 %1035 }
 0x521   : > { %1049 = vst [vmem:[%s479_s27 + $0x8] sm:$0xff] %v1036_v58 }
 0x522   : > { %v1031_v59 = vpop.permute.xlu0 %1030 }
 0x523   : > { %1048 = vst [vmem:[%s479_s27] sm:$0xff] %v1031_v59 }
 0x526   : > { %v1041_v60 = vpop.permute.xlu1 %1040 }
 0x527   : > { %1050 = vst [vmem:[%s479_s27 + $0x10] sm:$0xff] %v1041_v60 }
 0x52a   : > { %v1046_v61 = vpop.permute.xlu1 %1045 }
 0x52b   : > { %1051 = vst [vmem:[%s479_s27 + $0x18] sm:$0xff] %v1046_v61 }
 0x52c   : > { %1313 = shalt.err (!%p1310_p3)
}
 0x52d   : > { %s1314_s22 = scalar_lea.hbm %s1614_s21, 512  ;;  %s1318_s19 = scalar_lea.hbm %s1670_s14, 1024 }
 0x52e   : > { %p1315_p4 = scmp.ne.s32.totalorder %s1614_s21, %s1314_s22  ;;  %p1319_p9 = scmp.lt.s32.totalorder %s1614_s21, %s1670_s14 }
 0x52f   : > { %p1320_p10 = scmp.lt.s32.totalorder %s1318_s19, %s1314_s22 }
 0x530   : > { %p1316_p7 = pnand %p1315_p4, %p1482_p5 }
 0x531   : > { %p1321_p11 = por %p1320_p10, %p1319_p9 }
 0x532   : > { %p1317_p8 = pneg %p1316_p7 }
 0x534   : > { %p1322_p12 = pnand %p1321_p11, %p1317_p8 }
 0x536   : > { %1325 = shalt.err (!%p1322_p12)
}
 0x537   : > { %s1364_s1 = smov 128   ;;  %s1365_s2 = smov 8  }
 0x538   : > { %1240 = dma.vmem_to_hbm [thread:$0]  (%p1482_p5), %s1609_s28, 512, %s1614_s21, %s1616_s30, %s1364_s1, %s1364_s1, %s1365_s2  }
 0x539 PF: > { %p1246_p13 = scmp.ge.s32.totalorder %s1360_s18, 2  ;;  %s1081_s26 = sand.u32 1, %s1348_s15  }
 0x53a   : > { %s1082_s22 = scalar_lea.sflag [#allocation4], %s1081_s26 }
 0x53b   : > { %p1243_p0 = pnand %p1246_p13, %p1486_p6 }
 0x53d   : > { %p1244_p1 = pneg %p1243_p0 }
 0x53f   : > { %1343 = dma.done.wait (%p1244_p1), %s1082_s22, 512  }
 0x540   : > { %1345 = vsyncadd (%p1244_p1), %s1082_s22, 4294966784  ;;  %p26_p2 = scmp.ge.s32.totalorder %s1469_s20, 4   ;;  %s1681_s15 = smov %s1352_s16 }
 0x541   : > { %s1682_s16 = smov %s1356_s17  ;;  %s1683_s17 = smov %s1480_s23 }
 0x542   : > { %s1684_s18 = smov %s1469_s20  ;;  %28 = sbr.rel (!%p26_p2) target bundleno = 7 (0x7), region = 114 }
 0x547   :  { %1087 = vsyncpa [#allocation4], 1 }
 0x548   :  { %1089 = vsyncpa [#allocation4 + $0x1], 1 }

</bundles_post_ra>
